<compile_context>
chip_gen: v5e
topology: v5e:2x2
jax: 0.10.0
libtpu: 0.0.40
codegen_flags: <defaults>
</compile_context>

<pallas_src>
import functools

import jax
import jax.numpy as jnp
from jax.experimental import pallas as pl
from jax.experimental.pallas import tpu as pltpu


def upsample_kernel(x_ref, w_ref, scale_ref, shift_ref, o_ref):
    """One M-tile.

    x_ref:     (tile_m, K)      im2col rows (K = kH*kW*Ci)
    w_ref:     (K, Co_pad)      flipped conv-transpose weight, Cout zero-padded to 128 lanes
    scale_ref: (1, Co_pad)      folded batchnorm scale (gamma / sqrt(var+eps))
    shift_ref: (1, Co_pad)      folded batchnorm shift + conv bias (bias*scale + shift)
    o_ref:     (tile_m, Co_pad) output rows (lane-dense)
    """
    acc = jnp.dot(x_ref[...], w_ref[...], preferred_element_type=jnp.float32)
    y = acc * scale_ref[...] + shift_ref[...]      # bias + eval-mode BN, fused
    o_ref[...] = jnp.maximum(y, 0.0).astype(o_ref.dtype)   # ReLU


@functools.partial(jax.jit, static_argnames=("kernel_size", "stride", "use_bf16"))
def upsample_forward(x1, x2, weight, bias, bn_scale, bn_shift, kernel_size, stride,
                     use_bf16=False):
    """Matches UpSample.forward(x1, x2) for NCHW float32 inputs."""
    kH, kW = kernel_size
    sH, sW = stride

    # ---- glue (plain JAX): pad x1 in H, concat on channels (NCHW) ----
    diffY = x2.shape[2] - x1.shape[2]
    x1p = jnp.pad(x1, ((0, 0), (0, 0), (diffY // 2, diffY - diffY // 2), (0, 0)))
    x = jnp.concatenate([x1p, x2], axis=1)          # (N, Ci, H, W)
    N, Ci, H, W = x.shape
    Cout = weight.shape[1]

    Hout = (H - 1) * sH + kH                        # conv-transpose height
    Wout = (W - 1) * sW + 1                         # width after the causal slice

    # NCHW -> NHWC, zero-insert by stride, pad so conv-transpose == plain conv.
    # H padded (kH-1) both sides; W padded (kW-1) on the left only, because the
    # causal slice drops the last (kW-1) output columns anyway.
    x_nhwc = jnp.transpose(x, (0, 2, 3, 1))
    Hd = (H - 1) * sH + 1
    Wd = (W - 1) * sW + 1
    x_dil = jnp.zeros((N, Hd, Wd, Ci), x.dtype).at[:, ::sH, ::sW, :].set(x_nhwc)
    x_pad = jnp.pad(x_dil, ((0, 0), (kH - 1, kH - 1), (kW - 1, 0), (0, 0)))

    # im2col slab so the kernel is a single fused (M, K) @ (K, Co) matmul.
    # TODO(synk): a polyphase (sub-pixel) decomposition would skip the zero rows
    # inserted by the stride and halve K; kept the dense form for simplicity.
    K = kH * kW * Ci
    taps = [x_pad[:, kh:kh + Hout, kw:kw + Wout, :]
            for kh in range(kH) for kw in range(kW)]
    im2col = jnp.concatenate(taps, axis=-1).reshape(N * Hout * Wout, K)
    M_total = N * Hout * Wout

    # Flipped conv-transpose weight flattened per tap, (kh, kw, ci) x (co):
    # wflip[kh,kw,ci,co] = W[ci,co,kH-1-kh,kW-1-kw]
    wflip = jnp.transpose(weight[:, :, ::-1, ::-1], (2, 3, 0, 1)).reshape(K, Cout)

    # Lane-dense output: pad Cout up to a multiple of 128 lanes.
    Co_pad = ((Cout + 127) // 128) * 128
    w_p = jnp.zeros((K, Co_pad), wflip.dtype).at[:, :Cout].set(wflip)
    scale_p = jnp.zeros((1, Co_pad), jnp.float32).at[0, :Cout].set(bn_scale)
    # Conv bias folded into the BN shift: (acc + b)*s + t == acc*s + (b*s + t).
    shift_p = jnp.zeros((1, Co_pad), jnp.float32).at[0, :Cout].set(bias * bn_scale + bn_shift)

    if use_bf16:
        # bf16 matmul inputs, f32 accumulation (v6e/v7x MXU fast path).
        im2col = im2col.astype(jnp.bfloat16)
        w_p = w_p.astype(jnp.bfloat16)

    # Tile the fused (batch*H*W) row dim: aim for 2 tiles so v7x's two
    # TensorCores both get work; cap the tile so per-step VMEM stays bounded
    # when scaled to production sizes.
    tile_m = (M_total + 1) // 2
    tile_m = ((tile_m + 15) // 16) * 16             # sublane-align (covers bf16 packing)
    tile_m = min(tile_m, 2048)
    n_tiles = (M_total + tile_m - 1) // tile_m
    M_pad = n_tiles * tile_m
    if M_pad != M_total:
        im2col = jnp.pad(im2col, ((0, M_pad - M_total), (0, 0)))

    out_flat = pl.pallas_call(
        upsample_kernel,
        out_shape=jax.ShapeDtypeStruct((M_pad, Co_pad), jnp.float32),
        grid_spec=pltpu.PrefetchScalarGridSpec(
            num_scalar_prefetch=0,
            grid=(n_tiles,),
            in_specs=[
                pl.BlockSpec((tile_m, K), lambda i: (i, 0)),
                pl.BlockSpec((K, Co_pad), lambda i: (0, 0)),
                pl.BlockSpec((1, Co_pad), lambda i: (0, 0)),
                pl.BlockSpec((1, Co_pad), lambda i: (0, 0)),
            ],
            out_specs=pl.BlockSpec((tile_m, Co_pad), lambda i: (i, 0)),
        ),
        compiler_params=pltpu.CompilerParams(dimension_semantics=("parallel",)),
    )(im2col, w_p, scale_p, shift_p)

    # Drop channel / row padding, reshape to NCHW (tiny tensor; wrapper glue).
    out = out_flat[:M_total, :Cout].reshape(N, Hout, Wout, Cout)
    return jnp.transpose(out, (0, 3, 1, 2))


def reference(x1, x2, weight, bias, bn_scale, bn_shift, kernel_size, stride):
    """Pure-JAX reference (lax conv with lhs dilation == conv transpose)."""
    kH, kW = kernel_size
    sH, sW = stride
    diffY = x2.shape[2] - x1.shape[2]
    x1p = jnp.pad(x1, ((0, 0), (0, 0), (diffY // 2, diffY - diffY // 2), (0, 0)))
    x = jnp.concatenate([x1p, x2], axis=1)
    w_oihw = jnp.transpose(weight[:, :, ::-1, ::-1], (1, 0, 2, 3))  # (Co, Ci, kH, kW)
    y = jax.lax.conv_general_dilated(
        x, w_oihw, window_strides=(1, 1),
        padding=[(kH - 1, kH - 1), (kW - 1, kW - 1)],
        lhs_dilation=(sH, sW), rhs_dilation=(1, 1),
        dimension_numbers=("NCHW", "OIHW", "NCHW"))
    y = y + bias[None, :, None, None]
    if kW > 1:
        y = y[:, :, :, :-(kW - 1)]                    # causal slice
    y = y * bn_scale[None, :, None, None] + bn_shift[None, :, None, None]
    return jnp.maximum(y, 0.0)


if __name__ == "__main__":
    key = jax.random.PRNGKey(0)
    k1, k2, k3, k4 = jax.random.split(key, 4)

    N = 2
    C1, C2 = 4, 4            # channels of x1 / x2; concat -> input_channel = 8
    H1, H2, W = 14, 16, 8
    in_channel = C1 + C2
    out_channel = 4
    kernel_size = (4, 3)
    stride = (2, 1)

    x1 = jax.random.normal(k1, (N, C1, H1, W), jnp.float32)
    x2 = jax.random.normal(k2, (N, C2, H2, W), jnp.float32)

    # Deterministic synthetic parameters (ConvTranspose2d weight is (Cin, Cout, kH, kW)).
    weight = 0.1 * jax.random.normal(k3, (in_channel, out_channel) + kernel_size, jnp.float32)
    bias = 0.1 * jax.random.normal(k4, (out_channel,), jnp.float32)

    # Eval-mode BatchNorm2d(out_channel), PyTorch default init, folded to scale/shift.
    eps = 1e-5
    gamma = jnp.ones((out_channel,), jnp.float32)
    beta = jnp.zeros((out_channel,), jnp.float32)
    run_mean = jnp.zeros((out_channel,), jnp.float32)
    run_var = jnp.ones((out_channel,), jnp.float32)
    bn_scale = gamma / jnp.sqrt(run_var + eps)
    bn_shift = beta - run_mean * bn_scale

    ref = reference(x1, x2, weight, bias, bn_scale, bn_shift, kernel_size, stride)

    # f32 path (tight check).
    out = upsample_forward(x1, x2, weight, bias, bn_scale, bn_shift, kernel_size, stride)
    out = jax.block_until_ready(out)
    assert out.shape == ref.shape, (out.shape, ref.shape)
    assert jnp.allclose(out, ref, atol=1e-4, rtol=1e-4), float(jnp.max(jnp.abs(out - ref)))

    # bf16-input / f32-accumulate path (v6e/v7x MXU fast path) — loose smoke check.
    out_bf16 = upsample_forward(x1, x2, weight, bias, bn_scale, bn_shift, kernel_size, stride,
                                use_bf16=True)
    out_bf16 = jax.block_until_ready(out_bf16)
    assert jnp.allclose(out_bf16, ref, atol=1e-1, rtol=1e-1), float(jnp.max(jnp.abs(out_bf16 - ref)))

    print("KERNEL_OK")
</pallas_src>

<mosaic_0001>
module attributes {stable_mosaic.version = 11 : i64} {
  func.func @upsample_kernel(%arg0: i32, %arg1: memref<272x96xf32, #tpu.memory_space<vmem>>, %arg2: memref<96x128xf32, #tpu.memory_space<vmem>>, %arg3: memref<1x128xf32, #tpu.memory_space<vmem>>, %arg4: memref<1x128xf32, #tpu.memory_space<vmem>>, %arg5: memref<272x128xf32, #tpu.memory_space<vmem>>) attributes {dimension_semantics = [#tpu.dimension_semantics<parallel>], iteration_bounds = array<i64: 2>, scalar_prefetch = 0 : i64, scratch_operands = 0 : i64, tpu.core_type = #tpu.core_type<tc>, window_params = [{transform_indices = @transform_0, window_bounds = array<i64: 272, 96>}, {pipeline_mode = #tpu.pipeline_mode<synchronous>, transform_indices = @transform_1, window_bounds = array<i64: 96, 128>}, {pipeline_mode = #tpu.pipeline_mode<synchronous>, transform_indices = @transform_2, window_bounds = array<i64: 1, 128>}, {pipeline_mode = #tpu.pipeline_mode<synchronous>, transform_indices = @transform_3, window_bounds = array<i64: 1, 128>}, {transform_indices = @transform_4, window_bounds = array<i64: 272, 128>}]} {
    %c0 = arith.constant 0 : index
    %c0_0 = arith.constant 0 : index
    %0 = vector.load %arg1[%c0, %c0_0] : memref<272x96xf32, #tpu.memory_space<vmem>>, vector<272x96xf32>
    %c0_1 = arith.constant 0 : index
    %c0_2 = arith.constant 0 : index
    %1 = vector.load %arg2[%c0_1, %c0_2] : memref<96x128xf32, #tpu.memory_space<vmem>>, vector<96x128xf32>
    %cst = arith.constant dense<0.000000e+00> : vector<272x128xf32>
    %2 = tpu.matmul %0, %1, %cst {dimension_numbers = #tpu.dot_dimension_numbers<[1], [0], [0], [1], [0, 0, 1, 1], [], []>} : vector<272x96xf32>, vector<96x128xf32>, vector<272x128xf32> -> vector<272x128xf32>
    %c0_3 = arith.constant 0 : index
    %c0_4 = arith.constant 0 : index
    %3 = vector.load %arg3[%c0_3, %c0_4] : memref<1x128xf32, #tpu.memory_space<vmem>>, vector<1x128xf32>
    %4 = vector.broadcast %3 : vector<1x128xf32> to vector<272x128xf32>
    %5 = arith.mulf %2, %4 : vector<272x128xf32>
    %c0_5 = arith.constant 0 : index
    %c0_6 = arith.constant 0 : index
    %6 = vector.load %arg4[%c0_5, %c0_6] : memref<1x128xf32, #tpu.memory_space<vmem>>, vector<1x128xf32>
    %7 = vector.broadcast %6 : vector<1x128xf32> to vector<272x128xf32>
    %8 = arith.addf %5, %7 : vector<272x128xf32>
    %cst_7 = arith.constant 0.000000e+00 : f32
    %9 = vector.broadcast %cst_7 : f32 to vector<272x128xf32>
    %10 = arith.maximumf %8, %9 : vector<272x128xf32>
    %c0_8 = arith.constant 0 : index
    %c0_9 = arith.constant 0 : index
    %11 = vector.load %arg5[%c0_8, %c0_9] : memref<272x128xf32, #tpu.memory_space<vmem>>, vector<272x128xf32>
    tpu.vector_store %arg5[%c0_8, %c0_9], %10 {strides = array<i32>} : memref<272x128xf32, #tpu.memory_space<vmem>>, vector<272x128xf32>,
    return
  }
  func.func @transform_0(%arg0: i32) -> (i32, i32) {
    %c0_i32 = arith.constant 0 : i32
    %c0_i32_0 = arith.constant 0 : i32
    return %arg0, %c0_i32 : i32, i32
  }
  func.func @transform_1(%arg0: i32) -> (i32, i32) {
    %c0_i32 = arith.constant 0 : i32
    %c0_i32_0 = arith.constant 0 : i32
    %c0_i32_1 = arith.constant 0 : i32
    return %c0_i32, %c0_i32_0 : i32, i32
  }
  func.func @transform_2(%arg0: i32) -> (i32, i32) {
    %c0_i32 = arith.constant 0 : i32
    %c0_i32_0 = arith.constant 0 : i32
    %c0_i32_1 = arith.constant 0 : i32
    return %c0_i32, %c0_i32_0 : i32, i32
  }
  func.func @transform_3(%arg0: i32) -> (i32, i32) {
    %c0_i32 = arith.constant 0 : i32
    %c0_i32_0 = arith.constant 0 : i32
    %c0_i32_1 = arith.constant 0 : i32
    return %c0_i32, %c0_i32_0 : i32, i32
  }
  func.func @transform_4(%arg0: i32) -> (i32, i32) {
    %c0_i32 = arith.constant 0 : i32
    %c0_i32_0 = arith.constant 0 : i32
    return %arg0, %c0_i32 : i32, i32
  }
}

</mosaic_0001>

<bundles_post_ra>
// kernel: upsample_forward.1
= control target key start
LH: loop header
LB: loop body
LE: loop exit
PB: predicated region body
PF: predicated region fallthrough
CT: control target
= control target key end

     0   :  { %s791_s15 = smov 0   ;;  %s1035_s0 = inlined_call_operand.vmem [shape: f32[544,96], index: 0, kind: input, shape index: {}]   ;;  %s1036_s1 = inlined_call_operand.vmem [shape: f32[96,128], index: 1, kind: input, shape index: {}]   ;;  %s1037_s2 = inlined_call_operand.vmem [shape: f32[1,128], index: 2, kind: input, shape index: {}]   ;;  %s1038_s3 = inlined_call_operand.vmem [shape: f32[1,128], index: 3, kind: input, shape index: {}]   ;;  %s1039_s4 = inlined_call_operand.vmem [shape: f32[544,128], index: 4, kind: output, shape index: {}]  }
   0x1 LB: > { %s669_s16 = sadd.s32 4294967295, %s764_s15   ;;  %p673_p0 = scmp.ge.s32.totalorder %s764_s15, 1  ;;  %s764_s15 = sphi %s791_s15, %s14_s15  }
   0x2   : > { %p163_p1 = scmp.lt.s32.totalorder %s764_s15, 3 }
   0x4   : > { %p164_p2 = pnand %p673_p0, %p163_p1 }
   0x5   : > { %s189_s23 = smul.u32 (!%p164_p2), 34, %s669_s16 }
   0x6   : > { %167 = sbr.rel (%p164_p2) target bundleno = 239 (0xef), region = 36 }
   0x7   : > { %p190_p3 = scmp.lt.s32.totalorder (!%p164_p2), %s189_s23, 67 }
   0xb   : > { %v246_v0 = vld [vmem:[%s1036_s1 + $0x58] sm:$0xff]  ;;  %v245_v1 = vld [vmem:[%s1036_s1 + $0x50] sm:$0xff]  ;;  %v244_v2 = vld [vmem:[%s1036_s1 + $0x48] sm:$0xff]  ;;  %s1041_s23 = smov (!%p190_p3, %s189_s23), 67  ;;  %vm247_vm0 = vcmask 785408  }
   0xc   : > { %713 = vmatpush.msra.mxu2 %v246_v0  ;;  %714 = vmatpush.msra.mxu3 %v246_v0  ;;  %v243_v3 = vld [vmem:[%s1036_s1 + $0x40] sm:$0xff]  ;;  %v242_v4 = vld [vmem:[%s1036_s1 + $0x38] sm:$0xff]  ;;  %v241_v5 = vld [vmem:[%s1036_s1 + $0x30] sm:$0xff]  ;;  %s674_s10 = sshll.u32 %s1041_s23, 3 }
   0xd   : > { %354 = vmatpush.msra.mxu0 %v246_v0  ;;  %712 = vmatpush.msra.mxu1 %v246_v0  ;;  %v240_v6 = vld [vmem:[%s1036_s1 + $0x28] sm:$0xff]  ;;  %v239_v7 = vld [vmem:[%s1036_s1 + $0x20] sm:$0xff]  ;;  %v238_v8 = vld [vmem:[%s1036_s1 + $0x18] sm:$0xff]  ;;  %s840_s18 = scalar_lea.vmem %s1035_s0, %s674_s10  ;;  %s934_s28 = scalar_lea.vmem %s1039_s4, %s674_s10 }
   0xe   : > { %716 = vmatpush.msra.mxu2 %v245_v1  ;;  %717 = vmatpush.msra.mxu3 %v245_v1  ;;  %v237_v9 = vld [vmem:[%s1036_s1 + $0x10] sm:$0xff]  ;;  %v236_v10 = vld [vmem:[%s1036_s1 + $0x8] sm:$0xff]  ;;  %v235_v11 = vld [vmem:[%s1036_s1] sm:$0xff] }
   0xf   : > { %355 = vmatpush.msra.mxu0 %v245_v1  ;;  %715 = vmatpush.msra.mxu1 %v245_v1  ;;  %v217_v12 = vld [vmem:[%s840_s18 + $0x80] sm:$0xff]  ;;  %v226_v13 = vld [vmem:[%s840_s18 + $0xc8] sm:$0xff]  ;;  %v227_v17 = vld [vmem:[%s840_s18 + $0xd0] sm:$0xff] }
  0x10   : > { %719 = vmatpush.msra.mxu2 %v244_v2  ;;  %720 = vmatpush.msra.mxu3 %v244_v2  ;;  %v201_v14 = vld [vmem:[%s840_s18] sm:$0xff]  ;;  %v218_v16 = vld [vmem:[%s840_s18 + $0x88] sm:$0xff]  ;;  %v219_v20 = vld [vmem:[%s840_s18 + $0x90] sm:$0xff] }
  0x11   : > { %356 = vmatpush.msra.mxu0 %v244_v2  ;;  %718 = vmatpush.msra.mxu1 %v244_v2  ;;  %v209_v15 = vld [vmem:[%s840_s18 + $0x40] sm:$0xff]  ;;  %v202_v18 = vld [vmem:[%s840_s18 + $0x8] sm:$0xff]  ;;  %v228_v21 = vld [vmem:[%s840_s18 + $0xd8] sm:$0xff] }
  0x12   : > { %722 = vmatpush.msra.mxu2 %v243_v3  ;;  %723 = vmatpush.msra.mxu3 %v243_v3  ;;  %v210_v19 = vld [vmem:[%s840_s18 + $0x48] sm:$0xff]  ;;  %v203_v22 = vld [vmem:[%s840_s18 + $0x10] sm:$0xff]  ;;  %v220_v24 = vld [vmem:[%s840_s18 + $0x98] sm:$0xff] }
  0x13   : > { %357 = vmatpush.msra.mxu0 %v243_v3  ;;  %721 = vmatpush.msra.mxu1 %v243_v3  ;;  %v211_v23 = vld [vmem:[%s840_s18 + $0x50] sm:$0xff]  ;;  %v229_v25 = vld [vmem:[%s840_s18 + $0xe0] sm:$0xff]  ;;  %v204_v26 = vld [vmem:[%s840_s18 + $0x18] sm:$0xff] }
  0x14   : > { %725 = vmatpush.msra.mxu2 %v242_v4  ;;  %726 = vmatpush.msra.mxu3 %v242_v4  ;;  %v212_v27 = vld [vmem:[%s840_s18 + $0x58] sm:$0xff]  ;;  %v221_v28 = vld [vmem:[%s840_s18 + $0xa0] sm:$0xff]  ;;  %v230_v29 = vld [vmem:[%s840_s18 + $0xe8] sm:$0xff] }
  0x15   : > { %358 = vmatpush.msra.mxu0 %v242_v4  ;;  %724 = vmatpush.msra.mxu1 %v242_v4  ;;  %v205_v30 = vld [vmem:[%s840_s18 + $0x20] sm:$0xff]  ;;  %v222_v32 = vld [vmem:[%s840_s18 + $0xa8] sm:$0xff]  ;;  %v231_v33 = vld [vmem:[%s840_s18 + $0xf0] sm:$0xff] }
  0x16   : > { %728 = vmatpush.msra.mxu2 %v241_v5  ;;  %729 = vmatpush.msra.mxu3 %v241_v5  ;;  %v213_v31 = vld [vmem:[%s840_s18 + $0x60] sm:$0xff]  ;;  %v206_v34 = vld [vmem:[%s840_s18 + $0x28] sm:$0xff]  ;;  %v223_v36 = vld [vmem:[%s840_s18 + $0xb0] sm:$0xff] }
  0x17   : > { %359 = vmatpush.msra.mxu0 %v241_v5  ;;  %727 = vmatpush.msra.mxu1 %v241_v5  ;;  %v214_v35 = vld [vmem:[%s840_s18 + $0x68] sm:$0xff]  ;;  %v232_v37 = vld [vmem:[%s840_s18 + $0xf8] sm:$0xff]  ;;  %v207_v38 = vld [vmem:[%s840_s18 + $0x30] sm:$0xff] }
  0x18   : > { %731 = vmatpush.msra.mxu2 %v240_v6  ;;  %732 = vmatpush.msra.mxu3 %v240_v6  ;;  %v215_v39 = vld [vmem:[%s840_s18 + $0x70] sm:$0xff]  ;;  %v224_v40 = vld [vmem:[%s840_s18 + $0xb8] sm:$0xff]  ;;  %v233_v41 = vld [vmem:[%s840_s18 + $0x100] sm:$0xff] }
  0x19   : > { %360 = vmatpush.msra.mxu0 %v240_v6  ;;  %730 = vmatpush.msra.mxu1 %v240_v6  ;;  %v208_v42 = vld [vmem:[%s840_s18 + $0x38] sm:$0xff]  ;;  %v225_v44 = vld [vmem:[%s840_s18 + $0xc0] sm:$0xff]  ;;  %v234_v45 = vld [vmem:[%s840_s18 + $0x108] sm:$0xff] }
  0x1a   : > { %734 = vmatpush.msra.mxu2 %v239_v7  ;;  %735 = vmatpush.msra.mxu3 %v239_v7  ;;  %v216_v43 = vld [vmem:[%s840_s18 + $0x78] sm:$0xff]  ;;  %v916_v46 = vld [vmem:[%s1037_s2] ss:$0 sm:$0xff] }
  0x1b   : > { %361 = vmatpush.msra.mxu0 %v239_v7  ;;  %733 = vmatpush.msra.mxu1 %v239_v7  ;;  %v921_v49 = vld [vmem:[%s1038_s3] ss:$0 sm:$0xff] }
  0x1c   : > { %737 = vmatpush.msra.mxu2 %v238_v8  ;;  %738 = vmatpush.msra.mxu3 %v238_v8 }
  0x1d   : > { %362 = vmatpush.msra.mxu0 %v238_v8  ;;  %736 = vmatpush.msra.mxu1 %v238_v8 }
  0x1e   : > { %740 = vmatpush.msra.mxu2 %v237_v9  ;;  %741 = vmatpush.msra.mxu3 %v237_v9 }
  0x1f   : > { %363 = vmatpush.msra.mxu0 %v237_v9  ;;  %739 = vmatpush.msra.mxu1 %v237_v9 }
  0x20   : > { %743 = vmatpush.msra.mxu2 %v236_v10  ;;  %744 = vmatpush.msra.mxu3 %v236_v10 }
  0x21   : > { %364 = vmatpush.msra.mxu0 %v236_v10  ;;  %742 = vmatpush.msra.mxu1 %v236_v10 }
  0x22   : > { %746 = vmatpush.msra.mxu2 %v235_v11  ;;  %747 = vmatpush.msra.mxu3 %v235_v11 }
  0x23   : > { %692 = vmatmul.msk.f32.vlgmr.msra.gmra.mxu2 %vm247_vm0, %v217_v12  ;;  %701 = vmatmul.msk.f32.vlgmr.msra.gmra.mxu3 %vm247_vm0, %v226_v13 }
  0x24   : > { %365 = vmatpush.msra.mxu0 %v235_v11  ;;  %745 = vmatpush.msra.mxu1 %v235_v11 }
  0x25   : > { %676 = vmatmul.msk.f32.vlgmr.msra.gmra.mxu0 %vm247_vm0, %v201_v14  ;;  %684 = vmatmul.msk.f32.vlgmr.msra.gmra.mxu1 %vm247_vm0, %v209_v15 }
  0x2b   : > { %693 = vmatmul.msk.f32.gmra.mxu2 %vm247_vm0, %v218_v16  ;;  %702 = vmatmul.msk.f32.gmra.mxu3 %vm247_vm0, %v227_v17 }
  0x2d   : > { %677 = vmatmul.msk.f32.gmra.mxu0 %vm247_vm0, %v202_v18  ;;  %685 = vmatmul.msk.f32.gmra.mxu1 %vm247_vm0, %v210_v19 }
  0x33   : > { %694 = vmatmul.msk.f32.gmra.mxu2 %vm247_vm0, %v219_v20  ;;  %703 = vmatmul.msk.f32.gmra.mxu3 %vm247_vm0, %v228_v21 }
  0x35   : > { %678 = vmatmul.msk.f32.gmra.mxu0 %vm247_vm0, %v203_v22  ;;  %686 = vmatmul.msk.f32.gmra.mxu1 %vm247_vm0, %v211_v23 }
  0x3b   : > { %695 = vmatmul.msk.f32.gmra.mxu2 %vm247_vm0, %v220_v24  ;;  %704 = vmatmul.msk.f32.gmra.mxu3 %vm247_vm0, %v229_v25 }
  0x3d   : > { %679 = vmatmul.msk.f32.gmra.mxu0 %vm247_vm0, %v204_v26  ;;  %687 = vmatmul.msk.f32.gmra.mxu1 %vm247_vm0, %v212_v27 }
  0x43   : > { %696 = vmatmul.msk.f32.gmra.mxu2 %vm247_vm0, %v221_v28  ;;  %705 = vmatmul.msk.f32.gmra.mxu3 %vm247_vm0, %v230_v29 }
  0x45   : > { %680 = vmatmul.msk.f32.gmra.mxu0 %vm247_vm0, %v205_v30  ;;  %688 = vmatmul.msk.f32.gmra.mxu1 %vm247_vm0, %v213_v31 }
  0x4b   : > { %697 = vmatmul.msk.f32.gmra.mxu2 %vm247_vm0, %v222_v32  ;;  %706 = vmatmul.msk.f32.gmra.mxu3 %vm247_vm0, %v231_v33 }
  0x4d   : > { %681 = vmatmul.msk.f32.gmra.mxu0 %vm247_vm0, %v206_v34  ;;  %689 = vmatmul.msk.f32.gmra.mxu1 %vm247_vm0, %v214_v35 }
  0x53   : > { %698 = vmatmul.msk.f32.gmra.mxu2 %vm247_vm0, %v223_v36  ;;  %707 = vmatmul.msk.f32.gmra.mxu3 %vm247_vm0, %v232_v37 }
  0x55   : > { %682 = vmatmul.msk.f32.gmra.mxu0 %vm247_vm0, %v207_v38  ;;  %690 = vmatmul.msk.f32.gmra.mxu1 %vm247_vm0, %v215_v39 }
  0x5b   : > { %699 = vmatmul.msk.f32.gmra.mxu2 %vm247_vm0, %v224_v40  ;;  %708 = vmatmul.msk.f32.gmra.mxu3 %vm247_vm0, %v233_v41 }
  0x5d   : > { %683 = vmatmul.msk.f32.gmra.mxu0 %vm247_vm0, %v208_v42  ;;  %691 = vmatmul.msk.f32.gmra.mxu1 %vm247_vm0, %v216_v43 }
  0x63   : > { %700 = vmatmul.msk.f32.gmra.mxu2 %vm247_vm0, %v225_v44  ;;  %709 = vmatmul.msk.f32.gmra.mxu3 %vm247_vm0, %v234_v45 }
  0xa2   : > { %v367_v47 = vpop.f32.mrf.mxu0  ;;  %v391_v48 = vpop.f32.mrf.mxu1 }
  0xa3   : > { %v473_v50 = vmul.f32 %v916_v46, %v367_v47  ;;  %v481_v51 = vmul.f32 %v916_v46, %v391_v48 }
  0xa5   : > { %v511_v52 = vadd.f32 %v921_v49, %v473_v50  ;;  %v519_v53 = vadd.f32 %v921_v49, %v481_v51 }
  0xa6   : > { %v415_v54 = vpop.f32.mrf.mxu2  ;;  %v442_v55 = vpop.f32.mrf.mxu3 }
  0xa7   : > { %v489_v56 = vmul.f32 %v916_v46, %v415_v54  ;;  %v498_v57 = vmul.f32 %v916_v46, %v442_v55  ;;  %v545_v58 = vmax.f32 %v511_v52, 0.0  ;;  %v553_v59 = vmax.f32 %v519_v53, 0.0 }
  0xa9   : > { %v527_v60 = vadd.f32 %v921_v49, %v489_v56  ;;  %v536_v61 = vadd.f32 %v921_v49, %v498_v57  ;;  %579 = vst [vmem:[%s934_s28] sm:$0xff] %v545_v58 }
  0xaa   : > { %587 = vst [vmem:[%s934_s28 + $0x40] sm:$0xff] %v553_v59  ;;  %v370_v62 = vpop.f32.mrf.mxu0  ;;  %v394_v63 = vpop.f32.mrf.mxu1 }
  0xab   : > { %v561_v0 = vmax.f32 %v527_v60, 0.0  ;;  %v570_v1 = vmax.f32 %v536_v61, 0.0  ;;  %v474_v2 = vmul.f32 %v916_v46, %v370_v62  ;;  %v482_v3 = vmul.f32 %v916_v46, %v394_v63 }
  0xad   : > { %595 = vst [vmem:[%s934_s28 + $0x80] sm:$0xff] %v561_v0  ;;  %v512_v4 = vadd.f32 %v921_v49, %v474_v2  ;;  %v520_v5 = vadd.f32 %v921_v49, %v482_v3 }
  0xae   : > { %604 = vst [vmem:[%s934_s28 + $0xc8] sm:$0xff] %v570_v1  ;;  %v418_v6 = vpop.f32.mrf.mxu2  ;;  %v445_v7 = vpop.f32.mrf.mxu3 }
  0xaf   : > { %v490_v8 = vmul.f32 %v916_v46, %v418_v6  ;;  %v499_v9 = vmul.f32 %v916_v46, %v445_v7  ;;  %v546_v10 = vmax.f32 %v512_v4, 0.0  ;;  %v554_v11 = vmax.f32 %v520_v5, 0.0 }
  0xb1   : > { %v528_v12 = vadd.f32 %v921_v49, %v490_v8  ;;  %v537_v13 = vadd.f32 %v921_v49, %v499_v9  ;;  %580 = vst [vmem:[%s934_s28 + $0x8] sm:$0xff] %v546_v10 }
  0xb2   : > { %588 = vst [vmem:[%s934_s28 + $0x48] sm:$0xff] %v554_v11  ;;  %v373_v14 = vpop.f32.mrf.mxu0  ;;  %v397_v15 = vpop.f32.mrf.mxu1 }
  0xb3   : > { %v562_v16 = vmax.f32 %v528_v12, 0.0  ;;  %v571_v17 = vmax.f32 %v537_v13, 0.0  ;;  %v475_v18 = vmul.f32 %v916_v46, %v373_v14  ;;  %v483_v19 = vmul.f32 %v916_v46, %v397_v15 }
  0xb5   : > { %596 = vst [vmem:[%s934_s28 + $0x88] sm:$0xff] %v562_v16  ;;  %v513_v20 = vadd.f32 %v921_v49, %v475_v18  ;;  %v521_v21 = vadd.f32 %v921_v49, %v483_v19 }
  0xb6   : > { %605 = vst [vmem:[%s934_s28 + $0xd0] sm:$0xff] %v571_v17  ;;  %v421_v22 = vpop.f32.mrf.mxu2  ;;  %v448_v23 = vpop.f32.mrf.mxu3 }
  0xb7   : > { %v491_v24 = vmul.f32 %v916_v46, %v421_v22  ;;  %v500_v25 = vmul.f32 %v916_v46, %v448_v23  ;;  %v547_v26 = vmax.f32 %v513_v20, 0.0  ;;  %v555_v27 = vmax.f32 %v521_v21, 0.0 }
  0xb9   : > { %v529_v28 = vadd.f32 %v921_v49, %v491_v24  ;;  %v538_v29 = vadd.f32 %v921_v49, %v500_v25  ;;  %581 = vst [vmem:[%s934_s28 + $0x10] sm:$0xff] %v547_v26 }
  0xba   : > { %589 = vst [vmem:[%s934_s28 + $0x50] sm:$0xff] %v555_v27  ;;  %v376_v30 = vpop.f32.mrf.mxu0  ;;  %v400_v31 = vpop.f32.mrf.mxu1 }
  0xbb   : > { %v563_v32 = vmax.f32 %v529_v28, 0.0  ;;  %v572_v33 = vmax.f32 %v538_v29, 0.0  ;;  %v476_v34 = vmul.f32 %v916_v46, %v376_v30  ;;  %v484_v35 = vmul.f32 %v916_v46, %v400_v31 }
  0xbd   : > { %597 = vst [vmem:[%s934_s28 + $0x90] sm:$0xff] %v563_v32  ;;  %v514_v36 = vadd.f32 %v921_v49, %v476_v34  ;;  %v522_v37 = vadd.f32 %v921_v49, %v484_v35 }
  0xbe   : > { %606 = vst [vmem:[%s934_s28 + $0xd8] sm:$0xff] %v572_v33  ;;  %v424_v38 = vpop.f32.mrf.mxu2  ;;  %v451_v39 = vpop.f32.mrf.mxu3 }
  0xbf   : > { %v492_v40 = vmul.f32 %v916_v46, %v424_v38  ;;  %v501_v41 = vmul.f32 %v916_v46, %v451_v39  ;;  %v548_v42 = vmax.f32 %v514_v36, 0.0  ;;  %v556_v43 = vmax.f32 %v522_v37, 0.0 }
  0xc1   : > { %v530_v44 = vadd.f32 %v921_v49, %v492_v40  ;;  %v539_v45 = vadd.f32 %v921_v49, %v501_v41  ;;  %582 = vst [vmem:[%s934_s28 + $0x18] sm:$0xff] %v548_v42 }
  0xc2   : > { %590 = vst [vmem:[%s934_s28 + $0x58] sm:$0xff] %v556_v43  ;;  %v379_v47 = vpop.f32.mrf.mxu0  ;;  %v403_v48 = vpop.f32.mrf.mxu1 }
  0xc3   : > { %v564_v50 = vmax.f32 %v530_v44, 0.0  ;;  %v573_v51 = vmax.f32 %v539_v45, 0.0  ;;  %v477_v52 = vmul.f32 %v916_v46, %v379_v47  ;;  %v485_v53 = vmul.f32 %v916_v46, %v403_v48 }
  0xc5   : > { %598 = vst [vmem:[%s934_s28 + $0x98] sm:$0xff] %v564_v50  ;;  %v515_v54 = vadd.f32 %v921_v49, %v477_v52  ;;  %v523_v55 = vadd.f32 %v921_v49, %v485_v53 }
  0xc6   : > { %607 = vst [vmem:[%s934_s28 + $0xe0] sm:$0xff] %v573_v51  ;;  %v427_v56 = vpop.f32.mrf.mxu2  ;;  %v454_v57 = vpop.f32.mrf.mxu3 }
  0xc7   : > { %v493_v58 = vmul.f32 %v916_v46, %v427_v56  ;;  %v502_v59 = vmul.f32 %v916_v46, %v454_v57  ;;  %v549_v60 = vmax.f32 %v515_v54, 0.0  ;;  %v557_v61 = vmax.f32 %v523_v55, 0.0 }
  0xc9   : > { %v531_v62 = vadd.f32 %v921_v49, %v493_v58  ;;  %v540_v63 = vadd.f32 %v921_v49, %v502_v59  ;;  %583 = vst [vmem:[%s934_s28 + $0x20] sm:$0xff] %v549_v60 }
  0xca   : > { %591 = vst [vmem:[%s934_s28 + $0x60] sm:$0xff] %v557_v61  ;;  %v382_v0 = vpop.f32.mrf.mxu0  ;;  %v406_v1 = vpop.f32.mrf.mxu1 }
  0xcb   : > { %v565_v2 = vmax.f32 %v531_v62, 0.0  ;;  %v574_v3 = vmax.f32 %v540_v63, 0.0  ;;  %v478_v4 = vmul.f32 %v916_v46, %v382_v0  ;;  %v486_v5 = vmul.f32 %v916_v46, %v406_v1 }
  0xcd   : > { %599 = vst [vmem:[%s934_s28 + $0xa0] sm:$0xff] %v565_v2  ;;  %v516_v6 = vadd.f32 %v921_v49, %v478_v4  ;;  %v524_v7 = vadd.f32 %v921_v49, %v486_v5 }
  0xce   : > { %608 = vst [vmem:[%s934_s28 + $0xe8] sm:$0xff] %v574_v3  ;;  %v430_v8 = vpop.f32.mrf.mxu2  ;;  %v457_v9 = vpop.f32.mrf.mxu3 }
  0xcf   : > { %v494_v10 = vmul.f32 %v916_v46, %v430_v8  ;;  %v503_v11 = vmul.f32 %v916_v46, %v457_v9  ;;  %v550_v12 = vmax.f32 %v516_v6, 0.0  ;;  %v558_v13 = vmax.f32 %v524_v7, 0.0 }
  0xd1   : > { %v532_v14 = vadd.f32 %v921_v49, %v494_v10  ;;  %v541_v15 = vadd.f32 %v921_v49, %v503_v11  ;;  %584 = vst [vmem:[%s934_s28 + $0x28] sm:$0xff] %v550_v12 }
  0xd2   : > { %592 = vst [vmem:[%s934_s28 + $0x68] sm:$0xff] %v558_v13  ;;  %v385_v16 = vpop.f32.mrf.mxu0  ;;  %v409_v17 = vpop.f32.mrf.mxu1 }
  0xd3   : > { %v566_v18 = vmax.f32 %v532_v14, 0.0  ;;  %v575_v19 = vmax.f32 %v541_v15, 0.0  ;;  %v479_v20 = vmul.f32 %v916_v46, %v385_v16  ;;  %v487_v21 = vmul.f32 %v916_v46, %v409_v17 }
  0xd5   : > { %600 = vst [vmem:[%s934_s28 + $0xa8] sm:$0xff] %v566_v18  ;;  %v517_v22 = vadd.f32 %v921_v49, %v479_v20  ;;  %v525_v23 = vadd.f32 %v921_v49, %v487_v21 }
  0xd6   : > { %609 = vst [vmem:[%s934_s28 + $0xf0] sm:$0xff] %v575_v19  ;;  %v433_v24 = vpop.f32.mrf.mxu2  ;;  %v460_v25 = vpop.f32.mrf.mxu3 }
  0xd7   : > { %v495_v26 = vmul.f32 %v916_v46, %v433_v24  ;;  %v504_v27 = vmul.f32 %v916_v46, %v460_v25  ;;  %v551_v28 = vmax.f32 %v517_v22, 0.0  ;;  %v559_v29 = vmax.f32 %v525_v23, 0.0 }
  0xd9   : > { %v533_v30 = vadd.f32 %v921_v49, %v495_v26  ;;  %v542_v31 = vadd.f32 %v921_v49, %v504_v27  ;;  %585 = vst [vmem:[%s934_s28 + $0x30] sm:$0xff] %v551_v28 }
  0xda   : > { %593 = vst [vmem:[%s934_s28 + $0x70] sm:$0xff] %v559_v29  ;;  %v388_v32 = vpop.f32.mrf.mxu0  ;;  %v412_v33 = vpop.f32.mrf.mxu1 }
  0xdb   : > { %v567_v34 = vmax.f32 %v533_v30, 0.0  ;;  %v576_v35 = vmax.f32 %v542_v31, 0.0  ;;  %v480_v36 = vmul.f32 %v916_v46, %v388_v32  ;;  %v488_v37 = vmul.f32 %v916_v46, %v412_v33 }
  0xdd   : > { %601 = vst [vmem:[%s934_s28 + $0xb0] sm:$0xff] %v567_v34  ;;  %v518_v38 = vadd.f32 %v921_v49, %v480_v36  ;;  %v526_v39 = vadd.f32 %v921_v49, %v488_v37 }
  0xde   : > { %610 = vst [vmem:[%s934_s28 + $0xf8] sm:$0xff] %v576_v35  ;;  %v436_v40 = vpop.f32.mrf.mxu2  ;;  %v463_v41 = vpop.f32.mrf.mxu3 }
  0xdf   : > { %v496_v42 = vmul.f32 %v916_v46, %v436_v40  ;;  %v505_v43 = vmul.f32 %v916_v46, %v463_v41  ;;  %v552_v44 = vmax.f32 %v518_v38, 0.0  ;;  %v560_v45 = vmax.f32 %v526_v39, 0.0 }
  0xe1   : > { %v534_v47 = vadd.f32 %v921_v49, %v496_v42  ;;  %v543_v48 = vadd.f32 %v921_v49, %v505_v43  ;;  %586 = vst [vmem:[%s934_s28 + $0x38] sm:$0xff] %v552_v44 }
  0xe2   : > { %594 = vst [vmem:[%s934_s28 + $0x78] sm:$0xff] %v560_v45 }
  0xe3   : > { %v568_v50 = vmax.f32 %v534_v47, 0.0  ;;  %v577_v51 = vmax.f32 %v543_v48, 0.0 }
  0xe5   : > { %602 = vst [vmem:[%s934_s28 + $0xb8] sm:$0xff] %v568_v50 }
  0xe6   : > { %611 = vst [vmem:[%s934_s28 + $0x100] sm:$0xff] %v577_v51  ;;  %v439_v52 = vpop.f32.mrf.mxu2  ;;  %v466_v53 = vpop.f32.mrf.mxu3 }
  0xe7   : > { %v497_v54 = vmul.f32 %v916_v46, %v439_v52  ;;  %v506_v55 = vmul.f32 %v916_v46, %v466_v53 }
  0xe9   : > { %v535_v56 = vadd.f32 %v921_v49, %v497_v54  ;;  %v544_v57 = vadd.f32 %v921_v49, %v506_v55 }
  0xeb   : > { %v569_v58 = vmax.f32 %v535_v56, 0.0  ;;  %v578_v59 = vmax.f32 %v544_v57, 0.0 }
  0xed   : > { %603 = vst [vmem:[%s934_s28 + $0xc0] sm:$0xff] %v569_v58 }
  0xee   : > { %612 = vst [vmem:[%s934_s28 + $0x108] sm:$0xff] %v578_v59 }
  0xef PF: > { %s14_s15 = sadd.s32 1, %s764_s15  }
  0xf0   : > { %p11_p4 = scmp.ge.s32.totalorder %s14_s15, 4  }
  0xf2   :  { %13 = sbr.rel (!%p11_p4) target bundleno = 1 (0x1), region = 66 }

</bundles_post_ra>
